<compile_context>
chip_gen: v7x
topology: tpu7x:2x2x1
jax: 0.10.0
libtpu: 0.0.40
codegen_flags: <defaults>
</compile_context>

<pallas_src>
import functools

import jax
import jax.numpy as jnp
from jax.experimental import pallas as pl
from jax.experimental.pallas import tpu as pltpu


def _mhsa_kernel(x_ref, mask_ref, wqkv_ref, bqkv_ref, wo_ref, bo_ref, o_ref,
                 *, num_heads, head_dim, embed_dim):
    # Block shapes per grid step b:
    #   x_ref    : (1, L, E)        mask_ref : (1, 1, L, L)
    #   wqkv_ref : (E, 3E)          bqkv_ref : (1, 3E)    (grid-resident, DMA'd once)
    #   wo_ref   : (E, E)           bo_ref   : (1, E)     (grid-resident, DMA'd once)
    #   o_ref    : (1, L, E)
    x = x_ref[0]                                                         # (L, E)

    # Fused QKV projection: one (L,E)x(E,3E) matmul. 1/sqrt(Dh) pre-folded into q cols.
    qkv = (jnp.dot(x, wqkv_ref[...], preferred_element_type=jnp.float32)
           + bqkv_ref[...])                                              # (L, 3E)

    negmask = mask_ref[0, 0].astype(jnp.float32) * (-10000.0)            # (L, L)

    E = embed_dim
    out = None
    # Static (fully unrolled) loop over heads: static lane slices, zero grid overhead.
    for h in range(num_heads):
        lo = h * head_dim
        hi = lo + head_dim
        qh = qkv[:, lo:hi]                                               # (L, Dh)
        kh = qkv[:, E + lo:E + hi]                                       # (L, Dh)
        vh = qkv[:, 2 * E + lo:2 * E + hi]                               # (L, Dh)

        # q @ k^T without materializing a transpose (contract the last dims).
        s = jax.lax.dot_general(qh, kh, (((1,), (1,)), ((), ())),
                                preferred_element_type=jnp.float32)      # (L, L)
        s = s + negmask
        s = s - jnp.max(s, axis=-1, keepdims=True)
        p = jnp.exp(s)
        # Per-row reciprocal (L,1) + multiply instead of an (L,L) divide.
        p = p * pl.reciprocal(jnp.sum(p, axis=-1, keepdims=True), approx=False)
        # dropout -> identity (eval mode)

        ctx = jnp.dot(p, vh, preferred_element_type=jnp.float32)         # (L, Dh)
        # This head's slice of the output projection (== concat(ctx) @ Wo).
        contrib = jnp.dot(ctx, wo_ref[lo:hi, :],
                          preferred_element_type=jnp.float32)            # (L, E)
        out = contrib if out is None else out + contrib

    o_ref[0] = (out + bo_ref[...]).astype(o_ref.dtype)


def prepare_mhsa_params(params, num_heads):
    """One-time parameter re-layout (do at parameter-load time, NOT per forward call).

    Fuses q/k/v into a single (E, 3E) weight / (1, 3E) bias and folds 1/sqrt(head_dim)
    into the q columns, so the kernel needs no per-call reshapes or per-step scaling.
    """
    wq, bq, wk, bk, wv, bv, wo, bo = params
    embed_dim = wq.shape[0]
    head_dim = embed_dim // num_heads
    inv_scale = 1.0 / (float(head_dim) ** 0.5)
    w_qkv = jnp.concatenate([wq * inv_scale, wk, wv], axis=1)   # (E, 3E)
    b_qkv = jnp.concatenate([bq * inv_scale, bk, bv], axis=1)   # (1, 3E)
    return w_qkv, b_qkv, wo, bo


def multihead_self_attention(x, mask, prepped_params, *, num_heads):
    bs, length, embed_dim = x.shape
    head_dim = embed_dim // num_heads
    assert head_dim * num_heads == embed_dim
    w_qkv, b_qkv, wo, bo = prepped_params

    kernel = functools.partial(_mhsa_kernel, num_heads=num_heads,
                               head_dim=head_dim, embed_dim=embed_dim)

    return pl.pallas_call(
        kernel,
        out_shape=jax.ShapeDtypeStruct((bs, length, embed_dim), x.dtype),
        grid_spec=pltpu.PrefetchScalarGridSpec(
            num_scalar_prefetch=0,
            grid=(bs,),
            in_specs=[
                pl.BlockSpec((1, length, embed_dim), lambda b: (b, 0, 0)),      # x
                pl.BlockSpec((1, 1, length, length), lambda b: (b, 0, 0, 0)),   # mask
                pl.BlockSpec((embed_dim, 3 * embed_dim), lambda b: (0, 0)),     # w_qkv (resident)
                pl.BlockSpec((1, 3 * embed_dim), lambda b: (0, 0)),             # b_qkv (resident)
                pl.BlockSpec((embed_dim, embed_dim), lambda b: (0, 0)),         # wo   (resident)
                pl.BlockSpec((1, embed_dim), lambda b: (0, 0)),                 # bo   (resident)
            ],
            out_specs=pl.BlockSpec((1, length, embed_dim), lambda b: (b, 0, 0)),
        ),
        compiler_params=pltpu.CompilerParams(
            dimension_semantics=("parallel",)),
    )(x, mask, w_qkv, b_qkv, wo, bo)


def _reference(x, mask, params, num_heads):
    """Pure-JAX reference mirroring the PyTorch forward (eval mode)."""
    wq, bq, wk, bk, wv, bv, wo, bo = params
    bs, length, embed_dim = x.shape
    head_dim = embed_dim // num_heads
    scaler = float(head_dim) ** 0.5

    def proj(w, b):
        return (x @ w + b[0]).reshape(bs, length, num_heads, head_dim)

    k = proj(wk, bk).transpose(0, 2, 3, 1)   # (bs, H, Dh, L)
    q = proj(wq, bq).transpose(0, 2, 1, 3)   # (bs, H, L, Dh)
    v = proj(wv, bv).transpose(0, 2, 1, 3)   # (bs, H, L, Dh)

    s = jnp.matmul(q, k) / scaler            # (bs, H, L, L)
    s = s + mask * (-10000.0)
    p = jax.nn.softmax(s, axis=-1)
    ctx = jnp.matmul(p, v).transpose(0, 2, 1, 3).reshape(bs, length, embed_dim)
    return ctx @ wo + bo[0]


if __name__ == "__main__":
    bs, length, embed_dim, num_heads = 2, 16, 32, 4

    key = jax.random.PRNGKey(0)
    keys = jax.random.split(key, 11)

    x = jax.random.normal(keys[0], (bs, length, embed_dim), dtype=jnp.float32)
    # causal-style binary mask, broadcast over heads: 1 -> masked out (score += -10000)
    mask = (jnp.triu(jnp.ones((length, length), jnp.float32), k=1)
            [None, None, :, :].repeat(bs, axis=0))            # (bs, 1, L, L)

    def linear_params(kw, kb):
        # torch.nn.Linear weight is (out, in); we store it transposed as (in, out).
        w = 0.02 * jax.random.normal(kw, (embed_dim, embed_dim), dtype=jnp.float32)
        b = 0.02 * jax.random.normal(kb, (1, embed_dim), dtype=jnp.float32)
        return w, b

    wq, bq = linear_params(keys[1], keys[2])
    wk, bk = linear_params(keys[3], keys[4])
    wv, bv = linear_params(keys[5], keys[6])
    wo, bo = linear_params(keys[7], keys[8])
    params = (wq, bq, wk, bk, wv, bv, wo, bo)

    # One-time parameter prep (fused QKV + folded scale); reused across forward calls.
    prepped = prepare_mhsa_params(params, num_heads)
    prepped = jax.block_until_ready(prepped)

    out = multihead_self_attention(x, mask, prepped, num_heads=num_heads)
    out = jax.block_until_ready(out)

    ref = _reference(x, mask, params, num_heads)
    assert out.shape == (bs, length, embed_dim)
    assert jnp.allclose(out, ref, atol=1e-4, rtol=1e-4), "mismatch vs reference"

    print("KERNEL_OK")
</pallas_src>

<mosaic_0001>
module attributes {stable_mosaic.version = 11 : i64} {
  func.func @_mhsa_kernel(%arg0: i32, %arg1: memref<1x16x32xf32, #tpu.memory_space<vmem>>, %arg2: memref<1x1x16x16xf32, #tpu.memory_space<vmem>>, %arg3: memref<32x96xf32, #tpu.memory_space<vmem>>, %arg4: memref<1x96xf32, #tpu.memory_space<vmem>>, %arg5: memref<32x32xf32, #tpu.memory_space<vmem>>, %arg6: memref<1x32xf32, #tpu.memory_space<vmem>>, %arg7: memref<1x16x32xf32, #tpu.memory_space<vmem>>) attributes {dimension_semantics = [#tpu.dimension_semantics<parallel>], iteration_bounds = array<i64: 2>, scalar_prefetch = 0 : i64, scratch_operands = 0 : i64, tpu.core_type = #tpu.core_type<tc>, window_params = [{transform_indices = @transform_0, window_bounds = array<i64: 1, 16, 32>}, {transform_indices = @transform_1, window_bounds = array<i64: 1, 1, 16, 16>}, {pipeline_mode = #tpu.pipeline_mode<synchronous>, transform_indices = @transform_2, window_bounds = array<i64: 32, 96>}, {pipeline_mode = #tpu.pipeline_mode<synchronous>, transform_indices = @transform_3, window_bounds = array<i64: 1, 96>}, {pipeline_mode = #tpu.pipeline_mode<synchronous>, transform_indices = @transform_4, window_bounds = array<i64: 32, 32>}, {pipeline_mode = #tpu.pipeline_mode<synchronous>, transform_indices = @transform_5, window_bounds = array<i64: 1, 32>}, {transform_indices = @transform_6, window_bounds = array<i64: 1, 16, 32>}]} {
    %c0 = arith.constant 0 : index
    %c0_0 = arith.constant 0 : index
    %c0_1 = arith.constant 0 : index
    %0 = vector.load %arg1[%c0, %c0_0, %c0_1] : memref<1x16x32xf32, #tpu.memory_space<vmem>>, vector<1x16x32xf32>
    %1 = vector.shape_cast %0 : vector<1x16x32xf32> to vector<16x32xf32>
    %c0_2 = arith.constant 0 : index
    %c0_3 = arith.constant 0 : index
    %2 = vector.load %arg3[%c0_2, %c0_3] : memref<32x96xf32, #tpu.memory_space<vmem>>, vector<32x96xf32>
    %cst = arith.constant dense<0.000000e+00> : vector<16x96xf32>
    %3 = tpu.matmul %1, %2, %cst {dimension_numbers = #tpu.dot_dimension_numbers<[1], [0], [0], [1], [0, 0, 1, 1], [], []>} : vector<16x32xf32>, vector<32x96xf32>, vector<16x96xf32> -> vector<16x96xf32>
    %c0_4 = arith.constant 0 : index
    %c0_5 = arith.constant 0 : index
    %4 = vector.load %arg4[%c0_4, %c0_5] : memref<1x96xf32, #tpu.memory_space<vmem>>, vector<1x96xf32>
    %5 = vector.broadcast %4 : vector<1x96xf32> to vector<16x96xf32>
    %6 = arith.addf %3, %5 : vector<16x96xf32>
    %c0_6 = arith.constant 0 : index
    %c0_7 = arith.constant 0 : index
    %c0_8 = arith.constant 0 : index
    %c0_9 = arith.constant 0 : index
    %7 = vector.load %arg2[%c0_6, %c0_7, %c0_8, %c0_9] : memref<1x1x16x16xf32, #tpu.memory_space<vmem>>, vector<1x1x16x16xf32>
    %8 = vector.shape_cast %7 : vector<1x1x16x16xf32> to vector<16x16xf32>
    %cst_10 = arith.constant -1.000000e+04 : f32
    %9 = vector.broadcast %cst_10 : f32 to vector<16x16xf32>
    %10 = arith.mulf %8, %9 : vector<16x16xf32>
    %11 = vector.extract_strided_slice %6 {offsets = [0, 0], sizes = [16, 8], strides = [1, 1]} : vector<16x96xf32> to vector<16x8xf32>
    %12 = vector.extract_strided_slice %6 {offsets = [0, 32], sizes = [16, 8], strides = [1, 1]} : vector<16x96xf32> to vector<16x8xf32>
    %13 = vector.extract_strided_slice %6 {offsets = [0, 64], sizes = [16, 8], strides = [1, 1]} : vector<16x96xf32> to vector<16x8xf32>
    %cst_11 = arith.constant dense<0.000000e+00> : vector<16x16xf32>
    %14 = tpu.matmul %11, %12, %cst_11 {dimension_numbers = #tpu.dot_dimension_numbers<[1], [1], [0], [0], [0, 0, 1, 0], [], []>} : vector<16x8xf32>, vector<16x8xf32>, vector<16x16xf32> -> vector<16x16xf32>
    %15 = arith.addf %14, %10 : vector<16x16xf32>
    %cst_12 = arith.constant dense<0xFF800000> : vector<16xf32>
    %16 = vector.multi_reduction <maximumf>, %15, %cst_12 [1] : vector<16x16xf32> to vector<16xf32>
    %17 = vector.shape_cast %16 : vector<16xf32> to vector<16x1xf32>
    %18 = vector.broadcast %17 : vector<16x1xf32> to vector<16x16xf32>
    %19 = arith.subf %15, %18 : vector<16x16xf32>
    %20 = math.exp %19 : vector<16x16xf32>
    %cst_13 = arith.constant dense<0.000000e+00> : vector<16xf32>
    %21 = vector.multi_reduction <add>, %20, %cst_13 [1] : vector<16x16xf32> to vector<16xf32>
    %22 = vector.shape_cast %21 : vector<16xf32> to vector<16x1xf32>
    %23 = tpu.reciprocal %22 : vector<16x1xf32> -> vector<16x1xf32>
    %24 = vector.broadcast %23 : vector<16x1xf32> to vector<16x16xf32>
    %25 = arith.mulf %20, %24 : vector<16x16xf32>
    %cst_14 = arith.constant dense<0.000000e+00> : vector<16x8xf32>
    %26 = tpu.matmul %25, %13, %cst_14 {dimension_numbers = #tpu.dot_dimension_numbers<[1], [0], [0], [1], [0, 0, 1, 1], [], []>} : vector<16x16xf32>, vector<16x8xf32>, vector<16x8xf32> -> vector<16x8xf32>
    %c0_15 = arith.constant 0 : index
    %c0_16 = arith.constant 0 : index
    %27 = vector.load %arg5[%c0_15, %c0_16] : memref<32x32xf32, #tpu.memory_space<vmem>>, vector<8x32xf32>
    %cst_17 = arith.constant dense<0.000000e+00> : vector<16x32xf32>
    %28 = tpu.matmul %26, %27, %cst_17 {dimension_numbers = #tpu.dot_dimension_numbers<[1], [0], [0], [1], [0, 0, 1, 1], [], []>} : vector<16x8xf32>, vector<8x32xf32>, vector<16x32xf32> -> vector<16x32xf32>
    %29 = vector.extract_strided_slice %6 {offsets = [0, 8], sizes = [16, 8], strides = [1, 1]} : vector<16x96xf32> to vector<16x8xf32>
    %30 = vector.extract_strided_slice %6 {offsets = [0, 40], sizes = [16, 8], strides = [1, 1]} : vector<16x96xf32> to vector<16x8xf32>
    %31 = vector.extract_strided_slice %6 {offsets = [0, 72], sizes = [16, 8], strides = [1, 1]} : vector<16x96xf32> to vector<16x8xf32>
    %cst_18 = arith.constant dense<0.000000e+00> : vector<16x16xf32>
    %32 = tpu.matmul %29, %30, %cst_18 {dimension_numbers = #tpu.dot_dimension_numbers<[1], [1], [0], [0], [0, 0, 1, 0], [], []>} : vector<16x8xf32>, vector<16x8xf32>, vector<16x16xf32> -> vector<16x16xf32>
    %33 = arith.addf %32, %10 : vector<16x16xf32>
    %cst_19 = arith.constant dense<0xFF800000> : vector<16xf32>
    %34 = vector.multi_reduction <maximumf>, %33, %cst_19 [1] : vector<16x16xf32> to vector<16xf32>
    %35 = vector.shape_cast %34 : vector<16xf32> to vector<16x1xf32>
    %36 = vector.broadcast %35 : vector<16x1xf32> to vector<16x16xf32>
    %37 = arith.subf %33, %36 : vector<16x16xf32>
    %38 = math.exp %37 : vector<16x16xf32>
    %cst_20 = arith.constant dense<0.000000e+00> : vector<16xf32>
    %39 = vector.multi_reduction <add>, %38, %cst_20 [1] : vector<16x16xf32> to vector<16xf32>
    %40 = vector.shape_cast %39 : vector<16xf32> to vector<16x1xf32>
    %41 = tpu.reciprocal %40 : vector<16x1xf32> -> vector<16x1xf32>
    %42 = vector.broadcast %41 : vector<16x1xf32> to vector<16x16xf32>
    %43 = arith.mulf %38, %42 : vector<16x16xf32>
    %cst_21 = arith.constant dense<0.000000e+00> : vector<16x8xf32>
    %44 = tpu.matmul %43, %31, %cst_21 {dimension_numbers = #tpu.dot_dimension_numbers<[1], [0], [0], [1], [0, 0, 1, 1], [], []>} : vector<16x16xf32>, vector<16x8xf32>, vector<16x8xf32> -> vector<16x8xf32>
    %c8 = arith.constant 8 : index
    %c0_22 = arith.constant 0 : index
    %45 = vector.load %arg5[%c8, %c0_22] : memref<32x32xf32, #tpu.memory_space<vmem>>, vector<8x32xf32>
    %cst_23 = arith.constant dense<0.000000e+00> : vector<16x32xf32>
    %46 = tpu.matmul %44, %45, %cst_23 {dimension_numbers = #tpu.dot_dimension_numbers<[1], [0], [0], [1], [0, 0, 1, 1], [], []>} : vector<16x8xf32>, vector<8x32xf32>, vector<16x32xf32> -> vector<16x32xf32>
    %47 = arith.addf %28, %46 : vector<16x32xf32>
    %48 = vector.extract_strided_slice %6 {offsets = [0, 16], sizes = [16, 8], strides = [1, 1]} : vector<16x96xf32> to vector<16x8xf32>
    %49 = vector.extract_strided_slice %6 {offsets = [0, 48], sizes = [16, 8], strides = [1, 1]} : vector<16x96xf32> to vector<16x8xf32>
    %50 = vector.extract_strided_slice %6 {offsets = [0, 80], sizes = [16, 8], strides = [1, 1]} : vector<16x96xf32> to vector<16x8xf32>
    %cst_24 = arith.constant dense<0.000000e+00> : vector<16x16xf32>
    %51 = tpu.matmul %48, %49, %cst_24 {dimension_numbers = #tpu.dot_dimension_numbers<[1], [1], [0], [0], [0, 0, 1, 0], [], []>} : vector<16x8xf32>, vector<16x8xf32>, vector<16x16xf32> -> vector<16x16xf32>
    %52 = arith.addf %51, %10 : vector<16x16xf32>
    %cst_25 = arith.constant dense<0xFF800000> : vector<16xf32>
    %53 = vector.multi_reduction <maximumf>, %52, %cst_25 [1] : vector<16x16xf32> to vector<16xf32>
    %54 = vector.shape_cast %53 : vector<16xf32> to vector<16x1xf32>
    %55 = vector.broadcast %54 : vector<16x1xf32> to vector<16x16xf32>
    %56 = arith.subf %52, %55 : vector<16x16xf32>
    %57 = math.exp %56 : vector<16x16xf32>
    %cst_26 = arith.constant dense<0.000000e+00> : vector<16xf32>
    %58 = vector.multi_reduction <add>, %57, %cst_26 [1] : vector<16x16xf32> to vector<16xf32>
    %59 = vector.shape_cast %58 : vector<16xf32> to vector<16x1xf32>
    %60 = tpu.reciprocal %59 : vector<16x1xf32> -> vector<16x1xf32>
    %61 = vector.broadcast %60 : vector<16x1xf32> to vector<16x16xf32>
    %62 = arith.mulf %57, %61 : vector<16x16xf32>
    %cst_27 = arith.constant dense<0.000000e+00> : vector<16x8xf32>
    %63 = tpu.matmul %62, %50, %cst_27 {dimension_numbers = #tpu.dot_dimension_numbers<[1], [0], [0], [1], [0, 0, 1, 1], [], []>} : vector<16x16xf32>, vector<16x8xf32>, vector<16x8xf32> -> vector<16x8xf32>
    %c16 = arith.constant 16 : index
    %c0_28 = arith.constant 0 : index
    %64 = vector.load %arg5[%c16, %c0_28] : memref<32x32xf32, #tpu.memory_space<vmem>>, vector<8x32xf32>
    %cst_29 = arith.constant dense<0.000000e+00> : vector<16x32xf32>
    %65 = tpu.matmul %63, %64, %cst_29 {dimension_numbers = #tpu.dot_dimension_numbers<[1], [0], [0], [1], [0, 0, 1, 1], [], []>} : vector<16x8xf32>, vector<8x32xf32>, vector<16x32xf32> -> vector<16x32xf32>
    %66 = arith.addf %47, %65 : vector<16x32xf32>
    %67 = vector.extract_strided_slice %6 {offsets = [0, 24], sizes = [16, 8], strides = [1, 1]} : vector<16x96xf32> to vector<16x8xf32>
    %68 = vector.extract_strided_slice %6 {offsets = [0, 56], sizes = [16, 8], strides = [1, 1]} : vector<16x96xf32> to vector<16x8xf32>
    %69 = vector.extract_strided_slice %6 {offsets = [0, 88], sizes = [16, 8], strides = [1, 1]} : vector<16x96xf32> to vector<16x8xf32>
    %cst_30 = arith.constant dense<0.000000e+00> : vector<16x16xf32>
    %70 = tpu.matmul %67, %68, %cst_30 {dimension_numbers = #tpu.dot_dimension_numbers<[1], [1], [0], [0], [0, 0, 1, 0], [], []>} : vector<16x8xf32>, vector<16x8xf32>, vector<16x16xf32> -> vector<16x16xf32>
    %71 = arith.addf %70, %10 : vector<16x16xf32>
    %cst_31 = arith.constant dense<0xFF800000> : vector<16xf32>
    %72 = vector.multi_reduction <maximumf>, %71, %cst_31 [1] : vector<16x16xf32> to vector<16xf32>
    %73 = vector.shape_cast %72 : vector<16xf32> to vector<16x1xf32>
    %74 = vector.broadcast %73 : vector<16x1xf32> to vector<16x16xf32>
    %75 = arith.subf %71, %74 : vector<16x16xf32>
    %76 = math.exp %75 : vector<16x16xf32>
    %cst_32 = arith.constant dense<0.000000e+00> : vector<16xf32>
    %77 = vector.multi_reduction <add>, %76, %cst_32 [1] : vector<16x16xf32> to vector<16xf32>
    %78 = vector.shape_cast %77 : vector<16xf32> to vector<16x1xf32>
    %79 = tpu.reciprocal %78 : vector<16x1xf32> -> vector<16x1xf32>
    %80 = vector.broadcast %79 : vector<16x1xf32> to vector<16x16xf32>
    %81 = arith.mulf %76, %80 : vector<16x16xf32>
    %cst_33 = arith.constant dense<0.000000e+00> : vector<16x8xf32>
    %82 = tpu.matmul %81, %69, %cst_33 {dimension_numbers = #tpu.dot_dimension_numbers<[1], [0], [0], [1], [0, 0, 1, 1], [], []>} : vector<16x16xf32>, vector<16x8xf32>, vector<16x8xf32> -> vector<16x8xf32>
    %c24 = arith.constant 24 : index
    %c0_34 = arith.constant 0 : index
    %83 = vector.load %arg5[%c24, %c0_34] : memref<32x32xf32, #tpu.memory_space<vmem>>, vector<8x32xf32>
    %cst_35 = arith.constant dense<0.000000e+00> : vector<16x32xf32>
    %84 = tpu.matmul %82, %83, %cst_35 {dimension_numbers = #tpu.dot_dimension_numbers<[1], [0], [0], [1], [0, 0, 1, 1], [], []>} : vector<16x8xf32>, vector<8x32xf32>, vector<16x32xf32> -> vector<16x32xf32>
    %85 = arith.addf %66, %84 : vector<16x32xf32>
    %c0_36 = arith.constant 0 : index
    %c0_37 = arith.constant 0 : index
    %86 = vector.load %arg6[%c0_36, %c0_37] : memref<1x32xf32, #tpu.memory_space<vmem>>, vector<1x32xf32>
    %87 = vector.broadcast %86 : vector<1x32xf32> to vector<16x32xf32>
    %88 = arith.addf %85, %87 : vector<16x32xf32>
    %c0_38 = arith.constant 0 : index
    %c0_39 = arith.constant 0 : index
    %c0_40 = arith.constant 0 : index
    %89 = vector.load %arg7[%c0_38, %c0_39, %c0_40] : memref<1x16x32xf32, #tpu.memory_space<vmem>>, vector<1x16x32xf32>
    %90 = vector.shape_cast %89 : vector<1x16x32xf32> to vector<16x32xf32>
    %91 = vector.shape_cast %88 : vector<16x32xf32> to vector<1x16x32xf32>
    tpu.vector_store %arg7[%c0_38, %c0_39, %c0_40], %91 {strides = array<i32>} : memref<1x16x32xf32, #tpu.memory_space<vmem>>, vector<1x16x32xf32>,
    return
  }
  func.func @transform_0(%arg0: i32) -> (i32, i32, i32) {
    %c0_i32 = arith.constant 0 : i32
    %c0_i32_0 = arith.constant 0 : i32
    %c0_i32_1 = arith.constant 0 : i32
    return %arg0, %c0_i32, %c0_i32_0 : i32, i32, i32
  }
  func.func @transform_1(%arg0: i32) -> (i32, i32, i32, i32) {
    %c0_i32 = arith.constant 0 : i32
    %c0_i32_0 = arith.constant 0 : i32
    %c0_i32_1 = arith.constant 0 : i32
    %c0_i32_2 = arith.constant 0 : i32
    return %arg0, %c0_i32, %c0_i32_0, %c0_i32_1 : i32, i32, i32, i32
  }
  func.func @transform_2(%arg0: i32) -> (i32, i32) {
    %c0_i32 = arith.constant 0 : i32
    %c0_i32_0 = arith.constant 0 : i32
    %c0_i32_1 = arith.constant 0 : i32
    return %c0_i32, %c0_i32_0 : i32, i32
  }
  func.func @transform_3(%arg0: i32) -> (i32, i32) {
    %c0_i32 = arith.constant 0 : i32
    %c0_i32_0 = arith.constant 0 : i32
    %c0_i32_1 = arith.constant 0 : i32
    return %c0_i32, %c0_i32_0 : i32, i32
  }
  func.func @transform_4(%arg0: i32) -> (i32, i32) {
    %c0_i32 = arith.constant 0 : i32
    %c0_i32_0 = arith.constant 0 : i32
    %c0_i32_1 = arith.constant 0 : i32
    return %c0_i32, %c0_i32_0 : i32, i32
  }
  func.func @transform_5(%arg0: i32) -> (i32, i32) {
    %c0_i32 = arith.constant 0 : i32
    %c0_i32_0 = arith.constant 0 : i32
    %c0_i32_1 = arith.constant 0 : i32
    return %c0_i32, %c0_i32_0 : i32, i32
  }
  func.func @transform_6(%arg0: i32) -> (i32, i32, i32) {
    %c0_i32 = arith.constant 0 : i32
    %c0_i32_0 = arith.constant 0 : i32
    %c0_i32_1 = arith.constant 0 : i32
    return %arg0, %c0_i32, %c0_i32_0 : i32, i32, i32
  }
}

</mosaic_0001>

<bundles_post_ra>
// kernel: tpu_custom_call.1
= control target key start
LH: loop header
LB: loop body
LE: loop exit
PB: predicated region body
PF: predicated region fallthrough
CT: control target
= control target key end

     0   :  { %s2787_s0 = inlined_call_operand.hbm [shape: f32[2,16,32], index: 0, kind: input, shape index: {}]   ;;  %s2788_s1 = inlined_call_operand.hbm [shape: f32[2,1,16,16], index: 1, kind: input, shape index: {}]   ;;  %s2789_s2 = inlined_call_operand.hbm [shape: f32[32,96], index: 2, kind: input, shape index: {}]   ;;  %s2790_s3 = inlined_call_operand.vmem [shape: f32[1,96], index: 3, kind: input, shape index: {}]   ;;  %s2791_s4 = inlined_call_operand.hbm [shape: f32[32,32], index: 4, kind: input, shape index: {}]   ;;  %s2792_s5 = inlined_call_operand.vmem [shape: f32[1,32], index: 5, kind: input, shape index: {}]   ;;  %s2793_s6 = inlined_call_operand.hbm [shape: f32[2,16,32], index: 6, kind: output, shape index: {}]  }
   0x1   :  { %2801 = sst [smem:[#allocation16_spill]] %s2787_s0 }
   0x2   :  { %2802 = sst [smem:[#allocation17_spill]] %s2789_s2 }
   0x3   :  { %2803 = sst [smem:[#allocation18_spill]] %s2791_s4 }
   0x4   :  { %11 = vsyncpa [#allocation3], 0 }
   0x5   :  { %13 = vsyncpa [#allocation3 + $0x1], 0 }
   0x6   :  { %14 = vsyncpa [#allocation6], 0 }
   0x7   :  { %16 = vsyncpa [#allocation6 + $0x1], 0 }
   0x8   :  { %17 = vsyncpa [#allocation9], 0 }
   0x9   :  { %18 = vsyncpa [#allocation4], 0 }
   0xa   :  { %20 = vsyncpa [#allocation4 + $0x1], 0  ;;  %s2372_s21 = smov 0   ;;  %s2374_s22 = smov 0  }
   0xb   :  { %s2376_s23 = smov 0   ;;  %s2378_s24 = smov 0  }
   0xc LB: > { %s2393_s25 = sadd.s32 4294967295, %s2315_s24   ;;  %s1710_s26 = sadd.s32 4294967294, %s2315_s24   ;;  %s2315_s24 = sphi %s2378_s24, %s2829_s24   ;;  %s2311_s23 = sphi %s2376_s23, %s2828_s23   ;;  %s2307_s22 = sphi %s2374_s22, %s2827_s22   ;;  %s2303_s21 = sphi %s2372_s21, %s2826_s21  }
   0xd   : > { %p46_p0 = scmp.ne.s32.totalorder %s2307_s22, %s2303_s21  ;;  %p2794_p1 = scmp.eq.s32.totalorder %s2393_s25, 0 }
   0xe   : > { %p186_p3 = scmp.eq.s32.totalorder %s1710_s26, 1  ;;  %p1711_p5 = scmp.ge.s32.totalorder %s2315_s24, 1 }
   0xf   : > { %p2402_p4 = por %p2794_p1, %p46_p0  ;;  %p193_p7 = scmp.lt.s32.totalorder %s2315_s24, 3 }
  0x10   : > { %p2407_p6 = por %p186_p3, %p46_p0  ;;  %s2317_s30 = smov [#allocation7]  }
  0x11   : > { %s2804_s27 = scalar_select %p2402_p4, 1, 0 }
  0x12   : > { %s2805_s28 = scalar_select %p2407_p6, 1, 0 }
  0x13   : > { %p2412_p8 = pnand %p1711_p5, %p193_p7  ;;  %s205_s7 = sshll.u32 %s2317_s30, 4  ;;  %s2416_s7 = int_to_ptr.vmem [resolvable:$true] %s205_s7 }
  0x14   : > { %s2318_s9 = smov [#allocation8]   ;;  %s2808_s2 = sld [smem:[#allocation17_spill]] }
  0x15   : > { %p1976_p9 = pneg %p2412_p8  ;;  %s221_s10 = sshll.u32 %s2318_s9, 4  ;;  %s2427_s10 = int_to_ptr.vmem [resolvable:$true] %s221_s10 }
  0x17   : > { %p2423_p11 = pnand %p1976_p9, %p2794_p1 }
  0x19   : > { %p2123_p13 = pneg %p2423_p11 }
  0x1a   : > { %s2121_s13 = scalar_lea.hbm %s2808_s2, 512 }
  0x1b   : > { %p2122_p12 = scmp.ne.s32.totalorder %s2808_s2, %s2121_s13  ;;  %p2128_p5 = scmp.lt.u32.totalorder %s2121_s13, %s2808_s2 }
  0x1d   : > { %p2124_p0 = pnand %p2123_p13, %p2122_p12 }
  0x1f   : > { %p2125_p3 = pneg %p2124_p0 }
  0x21   : > { %p2130_p7 = pnand %p2128_p5, %p2125_p3 }
  0x23   : > { %2133 = shalt.err (!%p2130_p7)
}
  0x24   : > { %s2134_s18 = scalar_lea.vmem %s2416_s7, 512  ;;  %p2142_p2 = scmp.lt.s32.totalorder %s2416_s7, %s2416_s7 }
  0x25   : > { %p2135_p9 = scmp.ne.s32.totalorder %s2416_s7, %s2134_s18  ;;  %p2143_p12 = scmp.lt.s32.totalorder %s2134_s18, %s2134_s18 }
  0x27   : > { %p2137_p10 = pnand %p2135_p9, %p2123_p13  ;;  %p2144_p0 = por %p2143_p12, %p2142_p2 }
  0x29   : > { %p2138_p1 = pneg %p2137_p10 }
  0x2b   : > { %p2145_p6 = pnand %p2144_p0, %p2138_p1 }
  0x2d   : > { %2148 = shalt.err (!%p2145_p6)
}
  0x2e   : > { %s2795_s19 = smov 128   ;;  %s2797_s20 = smov 8  }
  0x2f   : > { %1979 = dma.hbm_to_vmem [thread:$0]  (!%p2423_p11), %s2808_s2, 512, %s2416_s7, [#allocation6], %s2795_s19, %s2795_s19, %s2797_s20  }
  0x30   : > { %s2809_s4 = sld [smem:[#allocation18_spill]] }
  0x36   : > { %s2149_s12 = scalar_lea.hbm %s2809_s4, 512 }
  0x37   : > { %p2150_p1 = scmp.ne.s32.totalorder %s2809_s4, %s2149_s12  ;;  %p2156_p10 = scmp.lt.u32.totalorder %s2149_s12, %s2809_s4 }
  0x39   : > { %p2152_p2 = pnand %p2150_p1, %p2123_p13 }
  0x3b   : > { %p2153_p6 = pneg %p2152_p2 }
  0x3d   : > { %p2158_p3 = pnand %p2156_p10, %p2153_p6 }
  0x3f   : > { %2161 = shalt.err (!%p2158_p3)
}
  0x40   : > { %s2162_s7 = scalar_lea.vmem %s2427_s10, 512  ;;  %p2170_p12 = scmp.lt.s32.totalorder %s2427_s10, %s2427_s10 }
  0x41   : > { %p2163_p5 = scmp.ne.s32.totalorder %s2427_s10, %s2162_s7  ;;  %p2171_p0 = scmp.lt.s32.totalorder %s2162_s7, %s2162_s7 }
  0x43   : > { %p2165_p7 = pnand %p2163_p5, %p2123_p13  ;;  %p2172_p1 = por %p2171_p0, %p2170_p12 }
  0x45   : > { %p2166_p9 = pneg %p2165_p7 }
  0x47   : > { %p2173_p2 = pnand %p2172_p1, %p2166_p9 }
  0x49   : > { %2176 = shalt.err (!%p2173_p2)
}
  0x4a   : > { %1982 = dma.hbm_to_vmem [thread:$0]  (!%p2423_p11), %s2809_s4, 512, %s2427_s10, [#allocation9], %s2795_s19, %s2795_s19, %s2797_s20  }
  0x4b   : > { %s2488_s8 = sadd.s32 1, %s2315_s24   ;;  %s33_s26 = sadd.s32 1, %s2311_s23 }
  0x4c   : > { %s30_s30 = ssub.s32 %s2315_s24, %s2488_s8  ;;  %p40_p13 = scmp.ne.s32.totalorder %s2311_s23, %s2307_s22 }
  0x4d   : > { %p31_p6 = scmp.eq.s32.totalorder %s30_s30, 0  ;;  %p41_p10 = scmp.eq.s32.totalorder %s2315_s24, 0 }
  0x4e   : > { %p2810_p3 = scmp.eq.s32.totalorder %s2393_s25, 1  ;;  %p1996_p7 = scmp.lt.s32.totalorder %s2315_s24, 2 }
  0x4f   : > { %s2504_s11 = scalar_select %p31_p6, %s2311_s23, %s33_s26  }
  0x50   : > { %p2498_p5 = por %p2810_p3, %p40_p13  ;;  %p42_p9 = por %p41_p10, %p40_p13 }
  0x51   : > { %s238_s12 = sand.u32 1, %s2311_s23   ;;  %s1768_s10 = sshll.u32 %s2315_s24, 8 }
  0x52   : > { %s2811_s9 = scalar_select %p2498_p5, 1, 0 }
  0x53   : > { %s1715_s13 = sshll.u32 %s238_s12, 4  ;;  %s2812_s0 = sld [smem:[#allocation16_spill]] }
  0x54   : > { %s242_s7 = scalar_lea.vmem [#allocation2], %s1715_s13  ;;  %p2515_p11 = pnand %p1996_p7, %p42_p9 }
  0x55   : > { %s249_s17 = sshll.u32 %s242_s7, 4  ;;  %s2522_s14 = scalar_lea.hbm %s2788_s1, %s1768_s10  ;;  %s2513_s17 = int_to_ptr.vmem [resolvable:$true] %s249_s17 }
  0x56   : > { %s263_s15 = scalar_lea.vmem [#allocation5], %s1715_s13  ;;  %s2526_s20 = scalar_lea.sflag [#allocation3], %s238_s12 }
  0x57   : > { %s2524_s19 = sshll.u32 %s263_s15, 4  ;;  %p2179_p0 = pneg %p2515_p11  ;;  %s2558_s19 = int_to_ptr.vmem [resolvable:$true] %s2524_s19 }
  0x59   : > { %s2511_s16 = scalar_lea.hbm %s2812_s0, %s1768_s10  ;;  %s2182_s26 = scalar_lea.hbm %s2812_s0, 512 }
  0x5a   : > { %s2177_s7 = scalar_lea.hbm %s2511_s16, 256  ;;  %p2183_p13 = scmp.lt.u32.totalorder %s2511_s16, %s2812_s0 }
  0x5b   : > { %p2178_p12 = scmp.ne.s32.totalorder %s2511_s16, %s2177_s7  ;;  %p2184_p6 = scmp.lt.u32.totalorder %s2182_s26, %s2177_s7 }
  0x5c   : > { %p2186_p3 = scmp.lt.u32.totalorder %s2177_s7, %s2511_s16 }
  0x5d   : > { %p2180_p1 = pnand %p2179_p0, %p2178_p12  ;;  %p2185_p10 = por %p2184_p6, %p2183_p13 }
  0x5f   : > { %p2181_p2 = pneg %p2180_p1  ;;  %p2187_p7 = por %p2186_p3, %p2185_p10 }
  0x61   : > { %p2188_p9 = pnand %p2187_p7, %p2181_p2 }
  0x63   : > { %2191 = shalt.err (!%p2188_p9)
}
  0x64   : > { %s2192_s12 = scalar_lea.vmem %s2513_s17, 256  ;;  %s2321_s2 = smov [#allocation2]  }
  0x65   : > { %p2193_p12 = scmp.ne.s32.totalorder %s2513_s17, %s2192_s12  ;;  %s2197_s4 = sshll.u32 %s2321_s2, 4  ;;  %s2198_s4 = int_to_ptr.vmem [resolvable:$false] %s2197_s4 }
  0x66   : > { %s2199_s13 = scalar_lea.vmem %s2198_s4, 512  ;;  %p2200_p4 = scmp.lt.s32.totalorder %s2513_s17, %s2198_s4 }
  0x67   : > { %p2195_p1 = pnand %p2193_p12, %p2179_p0  ;;  %p2201_p13 = scmp.lt.s32.totalorder %s2199_s13, %s2192_s12 }
  0x69   : > { %p2196_p5 = pneg %p2195_p1  ;;  %p2202_p6 = por %p2201_p13, %p2200_p4 }
  0x6b   : > { %p2203_p10 = pnand %p2202_p6, %p2196_p5 }
  0x6d   : > { %2206 = shalt.err (!%p2203_p10)
}
  0x6e   : > { %s2814_s15 = smov 8   ;;  %s2815_s7 = smov 128  }
  0x6f   : > { %1986 = dma.hbm_to_vmem [thread:$0]  (!%p2515_p11), %s2511_s16, 256, %s2513_s17, %s2526_s20, %s2815_s7, %s2815_s7, %s2814_s15  }
  0x70   : > { %s259_s26 = sand.u32 1, %s2315_s24   ;;  %s2207_s10 = scalar_lea.hbm %s2522_s14, 256 }
  0x71   : > { %s2561_s30 = scalar_lea.sflag [#allocation6], %s259_s26  ;;  %p2208_p4 = scmp.ne.s32.totalorder %s2522_s14, %s2207_s10 }
  0x72   : > { %s2212_s4 = scalar_lea.hbm %s2788_s1, 512  ;;  %p2213_p3 = scmp.lt.u32.totalorder %s2522_s14, %s2788_s1 }
  0x73   : > { %p2210_p5 = pnand %p2208_p4, %p2179_p0  ;;  %p2214_p7 = scmp.lt.u32.totalorder %s2212_s4, %s2207_s10 }
  0x74   : > { %p2216_p12 = scmp.lt.u32.totalorder %s2207_s10, %s2522_s14 }
  0x75   : > { %p2211_p2 = pneg %p2210_p5  ;;  %p2215_p9 = por %p2214_p7, %p2213_p3 }
  0x77   : > { %p2217_p1 = por %p2216_p12, %p2215_p9 }
  0x79   : > { %p2218_p13 = pnand %p2217_p1, %p2211_p2 }
  0x7b   : > { %2221 = shalt.err (!%p2218_p13)
}
  0x7c   : > { %s2222_s20 = scalar_lea.vmem %s2558_s19, 256  ;;  %s2322_s16 = smov [#allocation5]  }
  0x7d   : > { %p2223_p6 = scmp.ne.s32.totalorder %s2558_s19, %s2222_s20  ;;  %s2227_s17 = sshll.u32 %s2322_s16, 4  ;;  %s2228_s17 = int_to_ptr.vmem [resolvable:$false] %s2227_s17 }
  0x7e   : > { %s2229_s0 = scalar_lea.vmem %s2228_s17, 512  ;;  %p2230_p5 = scmp.lt.s32.totalorder %s2558_s19, %s2228_s17 }
  0x7f   : > { %p2225_p10 = pnand %p2223_p6, %p2179_p0  ;;  %p2231_p3 = scmp.lt.s32.totalorder %s2229_s0, %s2222_s20 }
  0x81   : > { %p2226_p4 = pneg %p2225_p10  ;;  %p2232_p7 = por %p2231_p3, %p2230_p5 }
  0x83   : > { %p2233_p9 = pnand %p2232_p7, %p2226_p4 }
  0x85   : > { %2236 = shalt.err (!%p2233_p9)
}
  0x86   : > { %1989 = dma.hbm_to_vmem [thread:$0]  (!%p2515_p11), %s2522_s14, 256, %s2558_s19, %s2561_s30, %s2815_s7, %s2815_s7, %s2814_s15  }
  0x87   : > { %282 = sbr.rel (%p2412_p8) target bundleno = 2556 (0x9fc), region = 44  ;;  %s2593_s26 = sand.u32 (!%p2412_p8), 1, %s2307_s22  }
  0x88   : > { %s2596_s10 = sshll.u32 (!%p2412_p8), %s2593_s26, 4  ;;  %s285_s18 = scalar_lea.sflag (!%p2412_p8), [#allocation3], %s2593_s26 }
  0x89   : > { %s288_s12 = scalar_lea.vmem (!%p2412_p8), [#allocation2], %s2596_s10  ;;  %p2816_p0 = scmp.ne.s32.totalorder (!%p2412_p8), %s2804_s27, 0 }
  0x8e   : > { %2282 = dma.done.wait (%p2816_p0), %s285_s18, 256  }
  0x8f   : > { %2284 = vsyncadd (%p2816_p0), %s285_s18, 4294967040  ;;  %s293_s29 = sand.u32 1, %s2393_s25   ;;  %s297_s14 = scalar_lea.vmem [#allocation5], %s2596_s10 }
  0x90   : > { %s294_s19 = scalar_lea.sflag [#allocation6], %s293_s29 }
  0x91   : > { %2286 = dma.done.wait (%p2816_p0), %s294_s19, 256  }
  0x92   : > { %2288 = vsyncadd (%p2816_p0), %s294_s19, 4294967040  ;;  %p2817_p8 = scmp.eq.s32.totalorder %s2393_s25, 0 }
  0x94   : > { %2290 = dma.done.wait (%p2817_p8), [#allocation6], 512   ;;  %p2818_p11 = pmov %p2817_p8 }
  0x95   : > { %p2819_p2 = pmov %p2817_p8 }
  0x96   : > { %2292 = vsyncadd (%p2818_p11), [#allocation6], 4294966784 }
  0x97   : > { %2294 = dma.done.wait (%p2819_p2), [#allocation9], 512   ;;  %p2820_p12 = pmov %p2819_p2 }
  0x98   : > { %vm352_vm0 = vcmask 261120   ;;  %v341_v0 = vld [vmem:[#allocation7] sm:$0xff]  ;;  %v342_v1 = vld [vmem:[#allocation7 + $0x8] sm:$0xff]  ;;  %v343_v2 = vld [vmem:[#allocation7 + $0x10] sm:$0xff]  ;;  %vm444_vm1 = vcmask 64512   ;;  %s2323_s7 = smov 96  }
  0x99   : > { %2296 = vsyncadd (%p2820_p12), [#allocation9], 4294966784  ;;  %v1908_v3 = vpack.c.bf16 %v342_v1, %v341_v0  ;;  %v344_v4 = vld [vmem:[#allocation7 + $0x18] sm:$0xff]  ;;  %v339_v5 = vld [vmem:[%s288_s12] sm:$0xff]  ;;  %vm528_vm3 = vcmask 130048   ;;  %s2324_s30 = smov 64  }
  0x9a   : > { %v1912_v6 = vpack.c.bf16 %v344_v4, %v343_v2  ;;  %1829 = vmatprep.mubr.msk.f32.mxu0 %vm352_vm0, %v339_v5  ;;  %v340_v7 = vld [vmem:[%s288_s12 + $0x8] sm:$0xff]  ;;  %v1727_v8 = vld [vmem:[%s2790_s3] ss:$0 sm:$0xff]  ;;  %vm2636_vm2 = vmpackc.low %vm444_vm1, %vm444_vm1  ;;  %s2325_s2 = smov 88   ;;  %s2326_s4 = smov 120  }
  0x9b   : > { %1909 = vmatprep.subr.bf16.mxu0 %v1908_v3  ;;  %v435_v19 = vld [vmem:[%s297_s14 + $0x8] sm:$0xff]  ;;  %v434_v20 = vld [vmem:[%s297_s14] sm:$0xff]  ;;  %s2327_s13 = smov 80   ;;  %s2328_s20 = smov 112  }
  0x9c   : > { %1911 = vmatpush3.bf16.msra.mxu0 %v1908_v3  ;;  %v2650_v21 = vmul.f32 -10000.0, %v435_v19  ;;  %v2652_v22 = vmul.f32 -10000.0, %v434_v20  ;;  %s2329_s16 = smov 56   ;;  %s2330_s17 = smov 72  }
  0x9d   : > { %1913 = vmatprep.subr.bf16.mxu0 %v1912_v6  ;;  %s2331_s0 = smov 104   ;;  %s2332_s18 = smov 48  }
  0x9e   : > { %s2333_s12 = smov 40   ;;  %s338_s29 = scalar_lea.vmem [#allocation10], %s2596_s10 }
  0x9f   : > { %s1595_s19 = sshll.u32 %s338_s29, 4  ;;  %s1770_s15 = sshll.u32 %s2393_s25, 8  ;;  %s2736_s19 = int_to_ptr.vmem [resolvable:$true] %s1595_s19 }
  0xa0   : > { %1915 = vmatpush3.bf16.msra.mxu0 %v1912_v6  ;;  %s1582_s10 = scalar_lea.sflag [#allocation4], %s2593_s26  ;;  %s2237_s25 = scalar_lea.vmem %s2736_s19, 256 }
  0xa1   : > { %p2238_p1 = scmp.ne.s32.totalorder %s2736_s19, %s2237_s25  ;;  %p2823_p13 = scmp.ne.s32.totalorder %s2811_s9, 0 }
  0xa3   : > { %1830 = vmatmul.mubr.msk.f32.vlgmr.msra.gmra.mrb[0].mxu0 %vm352_vm0, %v340_v7  ;;  %p2239_p6 = pnand %p2238_p1, %p2823_p13 }
  0xa5   : > { %p2240_p10 = pneg %p2239_p6 }
 0x176   : > { %v1831_v9 = vpop.f32.mrb[0].mxu0 }
 0x177   : > { %v2623_v10 = vadd.f32 %v1831_v9, %v1727_v8  ;;  %v425_v11 = vpop.f32.mrb[1].mxu0 }
 0x178   : > { %v2625_v12 = vadd.f32 %v1727_v8, %v425_v11 }
 0x17a   : > { %1836 = vmatprep.mubr.msk.f32.mxu1 %vm444_vm1, %v2625_v12  ;;  %v2631_v13 = vpack.i.bf16 %v2623_v10, %v2625_v12 }
 0x17c   : > { %2050 = vrot.lane.b32.xlu0 %v2631_v13, %s2323_s7 }
 0x1ee   : > { %v2051_v14 = vpop.permute.xlu0 %2050 }
 0x1ef   : > { %v2053_v15 = vunpack.i.h.bf16 %v2051_v14  ;;  %v2052_v16 = vunpack.i.l.bf16 %v2051_v14 }
 0x1f1   : > { %v1916_v18 = vpack.c.bf16 %v2053_v15, %v2052_v16 }
 0x1f3   : > { %1918 = vmatprep.subr.msk.bf16.mxu1 %vm2636_vm2, %v1916_v18 }
 0x1f4   : > { %1921 = vmatpush3.bf16.xpose.msk.msra.mxu1 %vm2636_vm2, %v1916_v18 }
 0x1fb   : > { %1837 = vmatmul.mubr.msk.f32.vlgmr.msra.gmra.mrb[0].mxu1 %vm444_vm1, %v2623_v10 }
 0x2ce   : > { %v1838_v23 = vpop.f32.mrb[0].mxu1 }
 0x2cf   : > { %v525_v24 = vadd.f32 %v1838_v23, %v2650_v21  ;;  %v519_v25 = vpop.f32.mrb[1].mxu1 }
 0x2d0   : > { %v520_v26 = vadd.f32 %v519_v25, %v2652_v22 }
 0x2d1   : > { %v532_v27 = vsel %vm528_vm3, %v525_v24, -inf }
 0x2d2   : > { %533 = vmax.xlane.f32.xlu1 %v532_v27  ;;  %v529_v28 = vsel %vm528_vm3, %v520_v26, -inf }
 0x2d3   : > { %530 = vmax.xlane.f32.xlu0 %v529_v28 }
 0x2e3   : > { %2055 = vrot.lane.b32.xlu1 %v2631_v13, %s2324_s30 }
 0x2e7   : > { %2060 = vrot.lane.b32.xlu1 %v2631_v13, %s2325_s2  ;;  %s2741_s2 = scalar_lea.hbm %s2793_s6, %s1770_s15 }
 0x2e9   : > { %641 = vrot.lane.b32.xlu0 %v2623_v10, %s2326_s4 }
 0x35f   : > { %v534_v29 = vpop.xlane.xlu1 %533 }
 0x360   : > { %v536_v30 = vsub.f32 %v525_v24, %v534_v29  ;;  %v531_v31 = vpop.xlane.xlu0 %530 }
 0x361   : > { %v535_v32 = vsub.f32 %v520_v26, %v531_v31 }
 0x362   : > { %v539_v33 = vmul.f32 1.442695, %v536_v30 }
 0x363   : > { %v537_v34 = vmul.f32 1.442695, %v535_v32  ;;  %v2056_v35 = vpop.permute.xlu1 %2055 }
 0x364   : > { %2089 = vpow2.f32 %v539_v33  ;;  %v2058_v36 = vunpack.i.h.bf16 %v2056_v35  ;;  %v2057_v37 = vunpack.i.l.bf16 %v2056_v35  ;;  %v642_v58 = vpop.permute.xlu0 %641 }
 0x365   : > { %2091 = vpow2.f32 %v537_v34 }
 0x366   : > { %v1922_v38 = vpack.c.bf16 %v2058_v36, %v2057_v37 }
 0x367   : > { %v2061_v39 = vpop.permute.xlu1 %2060 }
 0x368   : > { %v2063_v40 = vunpack.i.h.bf16 %v2061_v39  ;;  %v2062_v41 = vunpack.i.l.bf16 %v2061_v39  ;;  %1923 = vmatprep.subr.bf16.mxu1 %v1922_v38 }
 0x369   : > { %1925 = vmatpush3.bf16.msra.mxu1 %v1922_v38 }
 0x36a   : > { %v1926_v42 = vpack.c.bf16 %v2063_v40, %v2062_v41 }
 0x36c   : > { %1928 = vmatprep.subr.msk.bf16.mxu1 %vm2636_vm2, %v1926_v42 }
 0x36e   : > { %v2090_v43 = vpop.eup %2089 }
 0x36f   : > { %v544_v44 = vsel %vm528_vm3, %v2090_v43, 0.0  ;;  %v2092_v45 = vpop.eup %2091 }
 0x370   : > { %545 = vadd.xlane.f32.xlu1 %v544_v44  ;;  %v541_v46 = vsel %vm528_vm3, %v2092_v45, 0.0 }
 0x374   : > { %542 = vadd.xlane.f32.xlu1 %v541_v46 }
 0x385   : > { %639 = vrot.lane.b32.xlu1 %v2625_v12, %s2326_s4  ;;  %s2334_s4 = smov [#allocation10]  }
 0x389   : > { %2065 = vrot.lane.b32.xlu1 %v2631_v13, %s2327_s13  ;;  %s2241_s13 = sshll.u32 %s2334_s4, 4  ;;  %s2242_s13 = int_to_ptr.vmem [resolvable:$false] %s2241_s13 }
 0x38a   : > { %p2244_p4 = scmp.lt.s32.totalorder %s2736_s19, %s2242_s13 }
 0x38d   : > { %1002 = vrot.lane.b32.xlu1 %v2625_v12, %s2328_s20 }
 0x391   : > { %1004 = vrot.lane.b32.xlu1 %v2623_v10, %s2328_s20  ;;  %s2243_s20 = scalar_lea.vmem %s2242_s13, 512 }
 0x392   : > { %p2245_p5 = scmp.lt.s32.totalorder %s2243_s20, %s2237_s25 }
 0x394   : > { %p2246_p3 = por %p2245_p5, %p2244_p4 }
 0x396   : > { %p2247_p7 = pnand %p2246_p3, %p2240_p10 }
 0x3fd   : > { %v546_v47 = vpop.xlane.xlu1 %545 }
 0x3fe   : > { %2093 = vrcp.f32 %v546_v47 }
 0x401   : > { %v543_v48 = vpop.xlane.xlu1 %542 }
 0x402   : > { %2095 = vrcp.f32 %v543_v48 }
 0x405   : > { %v640_v49 = vpop.permute.xlu1 %639 }
 0x408   : > { %v2094_v51 = vpop.eup %2093 }
 0x409   : > { %v2066_v50 = vpop.permute.xlu1 %2065  ;;  %v550_v56 = vmul.f32 %v2094_v51, %v2090_v43 }
 0x40a   : > { %v2068_v53 = vunpack.i.h.bf16 %v2066_v50  ;;  %v2067_v54 = vunpack.i.l.bf16 %v2066_v50  ;;  %v638_v50 = vld [vmem:[#allocation8] sm:$0xff] }
 0x40c   : > { %v2096_v52 = vpop.eup %2095  ;;  %v1936_v57 = vpack.c.bf16 %v2068_v53, %v2067_v54 }
 0x40d   : > { %v549_v55 = vmul.f32 %v2096_v52, %v2092_v45  ;;  %v1003_v59 = vpop.permute.xlu1 %1002 }
 0x40f   : > { %1843 = vmatprep.mubr.msk.f32.mxu1 %vm528_vm3, %v549_v55 }
 0x410   : > { %1844 = vmatmul.mubr.msk.f32.vlgmr.msra.gmra.mrb[2].mxu1 %vm528_vm3, %v550_v56 }
 0x411   : > { %1931 = vmatpush3.bf16.xpose.msk.msra.mxu1 %vm2636_vm2, %v1926_v42  ;;  %1850 = vmatprep.mubr.msk.f32.mxu1 %vm444_vm1, %v640_v49  ;;  %v1005_v60 = vpop.permute.xlu1 %1004  ;;  %v839_v49 = vld [vmem:[#allocation8 + $0x8] sm:$0xff] }
 0x412   : > { %1938 = vmatprep.subr.msk.bf16.mxu1 %vm2636_vm2, %v1936_v57 }
 0x418   : > { %1851 = vmatmul.mubr.msk.f32.vlgmr.msra.gmra.mrb[4].mxu1 %vm444_vm1, %v642_v58 }
 0x419   : > { %1941 = vmatpush3.bf16.xpose.msk.msra.mxu1 %vm2636_vm2, %v1936_v57  ;;  %1874 = vmatprep.mubr.msk.f32.mxu1 %vm444_vm1, %v1003_v59 }
 0x420   : > { %1875 = vmatmul.mubr.msk.f32.vlgmr.msra.gmra.mrb[6].mxu1 %vm444_vm1, %v1005_v60 }
 0x4e3   : > { %v2681_v61 = vpop.f32.mrb[2].mxu1 }
 0x4e4   : > { %v2683_v62 = vpop.f32.mrb[3].mxu1 }
 0x4eb   : > { %v1852_v63 = vpop.f32.mrb[4].mxu1 }
 0x4ec   : > { %v727_v0 = vadd.f32 %v1852_v63, %v2650_v21  ;;  %v721_v1 = vpop.f32.mrb[5].mxu1 }
 0x4ed   : > { %v722_v2 = vadd.f32 %v721_v1, %v2652_v22 }
 0x4ee   : > { %v733_v3 = vsel %vm528_vm3, %v727_v0, -inf }
 0x4ef   : > { %734 = vmax.xlane.f32.xlu0 %v733_v3  ;;  %v730_v4 = vsel %vm528_vm3, %v722_v2, -inf }
 0x4f0   : > { %731 = vmax.xlane.f32.xlu1 %v730_v4 }
 0x4f3   : > { %v1876_v5 = vpop.f32.mrb[6].mxu1 }
 0x4f4   : > { %v1084_v6 = vpop.f32.mrb[7].mxu1  ;;  %v1090_v25 = vadd.f32 %v1876_v5, %v2650_v21 }
 0x4f5   : > { %v1085_v23 = vadd.f32 %v1084_v6, %v2652_v22 }
 0x4f6   : > { %v1096_v26 = vsel %vm528_vm3, %v1090_v25, -inf }
 0x4f7   : > { %v1093_v24 = vsel %vm528_vm3, %v1085_v23, -inf }
 0x57c   : > { %v735_v7 = vpop.xlane.xlu0 %734 }
 0x57d   : > { %v737_v8 = vsub.f32 %v727_v0, %v735_v7  ;;  %v732_v9 = vpop.xlane.xlu1 %731 }
 0x57e   : > { %v736_v11 = vsub.f32 %v722_v2, %v732_v9 }
 0x57f   : > { %v740_v14 = vmul.f32 1.442695, %v737_v8 }
 0x580   : > { %v738_v15 = vmul.f32 1.442695, %v736_v11 }
 0x581   : > { %2097 = vpow2.f32 %v740_v14 }
 0x582   : > { %2099 = vpow2.f32 %v738_v15 }
 0x58b   : > { %v2098_v16 = vpop.eup %2097 }
 0x58c   : > { %v2100_v18 = vpop.eup %2099  ;;  %v745_v19 = vsel %vm528_vm3, %v2098_v16, 0.0 }
 0x58d   : > { %746 = vadd.xlane.f32.xlu0 %v745_v19  ;;  %v742_v20 = vsel %vm528_vm3, %v2100_v18, 0.0 }
 0x58e   : > { %743 = vadd.xlane.f32.xlu1 %v742_v20 }
 0x59f   : > { %2070 = vrot.lane.b32.xlu1 %v2631_v13, %s2329_s16 }
 0x5a3   : > { %2075 = vrot.lane.b32.xlu0 %v2631_v13, %s2330_s17  ;;  %1286 = vrot.lane.b32.xlu1 %v2625_v12, %s2331_s0 }
 0x5a7   : > { %1288 = vrot.lane.b32.xlu1 %v2623_v10, %s2331_s0 }
 0x5c2   : > { %1094 = vmax.xlane.f32.xlu0 %v1093_v24 }
 0x5cb   : > { %1097 = vmax.xlane.f32.xlu1 %v1096_v26  ;;  %v1486_v26 = vld [vmem:[#allocation8 + $0x18] sm:$0xff] }
 0x5dc   : > { %2080 = vrot.lane.b32.xlu1 %v2631_v13, %s2332_s18 }
 0x5e0   : > { %2085 = vrot.lane.b32.xlu1 %v2631_v13, %s2333_s12 }
 0x61a   : > { %v747_v27 = vpop.xlane.xlu0 %746 }
 0x61b   : > { %2101 = vrcp.f32 %v747_v27  ;;  %v744_v12 = vpop.xlane.xlu1 %743 }
 0x61c   : > { %2103 = vrcp.f32 %v744_v12 }
 0x61e   : > { %v2076_v10 = vpop.permute.xlu0 %2075 }
 0x61f   : > { %v2078_v28 = vunpack.i.h.bf16 %v2076_v10  ;;  %v2077_v29 = vunpack.i.l.bf16 %v2076_v10  ;;  %v2071_v30 = vpop.permute.xlu1 %2070 }
 0x620   : > { %v2073_v31 = vunpack.i.h.bf16 %v2071_v30  ;;  %v2072_v32 = vunpack.i.l.bf16 %v2071_v30 }
 0x621   : > { %v1946_v33 = vpack.c.bf16 %v2078_v28, %v2077_v29 }
 0x622   : > { %v1932_v34 = vpack.c.bf16 %v2073_v31, %v2072_v32 }
 0x623   : > { %1948 = vmatprep.subr.msk.bf16.mxu1 %vm2636_vm2, %v1946_v33  ;;  %v1287_v35 = vpop.permute.xlu1 %1286 }
 0x624   : > { %1933 = vmatprep.subr.bf16.mxu0 %v1932_v34  ;;  %1951 = vmatpush3.bf16.xpose.msk.msra.mxu1 %vm2636_vm2, %v1946_v33  ;;  %v1762_v33 = vld [vmem:[%s2792_s5] ss:$0 sm:$0xff] }
 0x625   : > { %v2102_v13 = vpop.eup %2101  ;;  %1893 = vmatprep.mubr.msk.f32.mxu1 %vm444_vm1, %v1287_v35  ;;  %1935 = vmatpush3.bf16.msra.mxu0 %v1932_v34 }
 0x626   : > { %v2104_v36 = vpop.eup %2103  ;;  %v751_v38 = vmul.f32 %v2102_v13, %v2098_v16  ;;  %1860 = vmatprep.subr.mxu0 %v839_v49 }
 0x627   : > { %v750_v37 = vmul.f32 %v2104_v36, %v2100_v18  ;;  %v1289_v39 = vpop.permute.xlu1 %1288 }
 0x629   : > { %1857 = vmatprep.mubr.msk.f32.mxu0 %vm528_vm3, %v750_v37 }
 0x62a   : > { %1858 = vmatmul.mubr.msk.f32.vlgmr.msra.gmra.mrb[2].mxu0 %vm528_vm3, %v751_v38 }
 0x62b   : > { %1894 = vmatmul.mubr.msk.f32.vlgmr.msra.gmra.mrb[8].mxu1 %vm444_vm1, %v1289_v39  ;;  %1861 = vmatpush3.msra.mxu0 %v839_v49 }
 0x62c   : > { %1865 = vmatprep.subr.mxu0 %v638_v50 }
 0x64f   : > { %v1095_v40 = vpop.xlane.xlu0 %1094 }
 0x650   : > { %v1099_v41 = vsub.f32 %v1085_v23, %v1095_v40 }
 0x652   : > { %v1101_v42 = vmul.f32 1.442695, %v1099_v41 }
 0x654   : > { %2105 = vpow2.f32 %v1101_v42 }
 0x658   : > { %v1098_v17 = vpop.xlane.xlu1 %1097 }
 0x659   : > { %v1100_v43 = vsub.f32 %v1090_v25, %v1098_v17 }
 0x65b   : > { %v1103_v44 = vmul.f32 1.442695, %v1100_v43 }
 0x65c   : > { %v2081_v52 = vpop.permute.xlu1 %2080 }
 0x65d   : > { %2107 = vpow2.f32 %v1103_v44  ;;  %v2083_v54 = vunpack.i.h.bf16 %v2081_v52  ;;  %v2082_v55 = vunpack.i.l.bf16 %v2081_v52 }
 0x65e   : > { %v2106_v45 = vpop.eup %2105 }
 0x65f   : > { %v1105_v46 = vsel %vm528_vm3, %v2106_v45, 0.0  ;;  %v1942_v60 = vpack.c.bf16 %v2083_v54, %v2082_v55 }
 0x660   : > { %1106 = vadd.xlane.f32.xlu0 %v1105_v46  ;;  %v2086_v3 = vpop.permute.xlu1 %2085 }
 0x661   : > { %v2088_v7 = vunpack.i.h.bf16 %v2086_v3  ;;  %v2087_v8 = vunpack.i.l.bf16 %v2086_v3 }
 0x667   : > { %v2108_v47 = vpop.eup %2107 }
 0x668   : > { %v1108_v48 = vsel %vm528_vm3, %v2108_v47, 0.0 }
 0x669   : > { %1109 = vadd.xlane.f32.xlu0 %v1108_v48 }
 0x6ed   : > { %v1107_v51 = vpop.xlane.xlu0 %1106 }
 0x6ee   : > { %2109 = vrcp.f32 %v1107_v51 }
 0x6f6   : > { %v1110_v53 = vpop.xlane.xlu0 %1109 }
 0x6f7   : > { %2111 = vrcp.f32 %v1110_v53 }
 0x6f8   : > { %v2110_v2 = vpop.eup %2109 }
 0x6f9   : > { %v1113_v6 = vmul.f32 %v2110_v2, %v2106_v45 }
 0x6fd   : > { %v1859_v56 = vpop.f32.mrb[2].mxu0 }
 0x6fe   : > { %v830_v57 = vpop.f32.mrb[3].mxu0  ;;  %v1895_v58 = vpop.f32.mrb[8].mxu1 }
 0x6ff   : > { %1862 = vmatprep.mubr.msk.f32.mxu0 %vm444_vm1, %v830_v57  ;;  %v1368_v59 = vpop.f32.mrb[9].mxu1  ;;  %v1374_v0 = vadd.f32 %v1895_v58, %v2650_v21 }
 0x700   : > { %v1369_v63 = vadd.f32 %v1368_v59, %v2652_v22  ;;  %1863 = vmatmul.mubr.msk.f32.vlgmr.msra.gmra.mrb[4].mxu0 %vm444_vm1, %v1859_v56  ;;  %v1202_v22 = vld [vmem:[#allocation8 + $0x10] sm:$0xff] }
 0x701   : > { %1866 = vmatpush3.msra.mxu0 %v638_v50  ;;  %1867 = vmatprep.mubr.msk.f32.mxu0 %vm444_vm1, %v2683_v62  ;;  %v1380_v4 = vsel %vm528_vm3, %v1374_v0, -inf  ;;  %v2112_v5 = vpop.eup %2111  ;;  %v1952_v62 = vpack.c.bf16 %v2088_v7, %v2087_v8 }
 0x702   : > { %1943 = vmatprep.subr.bf16.mxu0 %v1942_v60  ;;  %v1377_v1 = vsel %vm528_vm3, %v1369_v63, -inf  ;;  %v1114_v21 = vmul.f32 %v2112_v5, %v2108_v47 }
 0x703   : > { %1378 = vmax.xlane.f32.xlu0 %v1377_v1 }
 0x707   : > { %1381 = vmax.xlane.f32.xlu0 %v1380_v4 }
 0x708   : > { %1868 = vmatmul.mubr.msk.f32.vlgmr.msra.gmra.mrb[4].mxu0 %vm444_vm1, %v2681_v61 }
 0x709   : > { %1945 = vmatpush3.bf16.msra.mxu0 %v1942_v60  ;;  %1881 = vmatprep.mubr.msk.f32.mxu0 %vm528_vm3, %v1113_v6 }
 0x70a   : > { %1884 = vmatprep.subr.mxu0 %v1202_v22 }
 0x70c   : > { %1882 = vmatmul.mubr.msk.f32.vlgmr.msra.gmra.mrb[6].mxu0 %vm528_vm3, %v1114_v21 }
 0x70d   : > { %1885 = vmatpush3.msra.mxu0 %v1202_v22 }
 0x70e   : > { %1953 = vmatprep.subr.bf16.mxu0 %v1952_v62 }
 0x790   : > { %v1379_v9 = vpop.xlane.xlu0 %1378 }
 0x791   : > { %v1383_v11 = vsub.f32 %v1369_v63, %v1379_v9 }
 0x793   : > { %v1385_v14 = vmul.f32 1.442695, %v1383_v11 }
 0x794   : > { %v1382_v15 = vpop.xlane.xlu0 %1381 }
 0x795   : > { %2113 = vpow2.f32 %v1385_v14  ;;  %v1384_v16 = vsub.f32 %v1374_v0, %v1382_v15 }
 0x797   : > { %v1387_v18 = vmul.f32 1.442695, %v1384_v16 }
 0x799   : > { %2115 = vpow2.f32 %v1387_v18 }
 0x79f   : > { %v2114_v19 = vpop.eup %2113 }
 0x7a0   : > { %v1389_v61 = vsel %vm528_vm3, %v2114_v19, 0.0 }
 0x7a1   : > { %1390 = vadd.xlane.f32.xlu0 %v1389_v61 }
 0x7a3   : > { %v2116_v20 = vpop.eup %2115 }
 0x7a4   : > { %v1392_v23 = vsel %vm528_vm3, %v2116_v20, 0.0 }
 0x7a5   : > { %1393 = vadd.xlane.f32.xlu0 %v1392_v23 }
 0x7df   : > { %v1883_v24 = vpop.f32.mrb[6].mxu0 }
 0x7e0   : > { %v1193_v25 = vpop.f32.mrb[7].mxu0 }
 0x7e1   : > { %1886 = vmatprep.mubr.msk.f32.mxu0 %vm444_vm1, %v1193_v25 }
 0x7e2   : > { %1887 = vmatmul.mubr.msk.f32.vlgmr.msra.gmra.mrb[4].mxu0 %vm444_vm1, %v1883_v24 }
 0x7e3   : > { %1955 = vmatpush3.bf16.msra.mxu0 %v1952_v62 }
 0x7e4   : > { %1903 = vmatprep.subr.mxu0 %v1486_v26 }
 0x82e   : > { %v1391_v27 = vpop.xlane.xlu0 %1390 }
 0x82f   : > { %2117 = vrcp.f32 %v1391_v27 }
 0x832   : > { %v1394_v12 = vpop.xlane.xlu0 %1393 }
 0x833   : > { %2119 = vrcp.f32 %v1394_v12 }
 0x839   : > { %v2118_v10 = vpop.eup %2117 }
 0x83a   : > { %v1397_v28 = vmul.f32 %v2118_v10, %v2114_v19 }
 0x83c   : > { %1900 = vmatprep.mubr.msk.f32.mxu0 %vm528_vm3, %v1397_v28 }
 0x83d   : > { %v2120_v29 = vpop.eup %2119 }
 0x83e   : > { %v1398_v30 = vmul.f32 %v2120_v29, %v2116_v20 }
 0x840   : > { %1901 = vmatmul.mubr.msk.f32.vlgmr.msra.gmra.mrb[8].mxu0 %vm528_vm3, %v1398_v30 }
 0x841   : > { %1904 = vmatpush3.msra.mxu0 %v1486_v26 }
 0x913   : > { %v1902_v31 = vpop.f32.mrb[8].mxu0 }
 0x914   : > { %v1477_v32 = vpop.f32.mrb[9].mxu0 }
 0x915   : > { %1905 = vmatprep.mubr.msk.f32.mxu0 %vm444_vm1, %v1477_v32 }
 0x916   : > { %1906 = vmatmul.mubr.msk.f32.vlgmr.msra.gmra.mrb[4].mxu0 %vm444_vm1, %v1902_v31 }
 0x9e9   : > { %v1907_v34 = vpop.f32.mrb[4].mxu0 }
 0x9ea   : > { %v1578_v35 = vadd.f32 %v1907_v34, %v1762_v33  ;;  %v1559_v13 = vpop.f32.mrb[5].mxu0 }
 0x9eb   : > { %v1577_v36 = vadd.f32 %v1762_v33, %v1559_v13 }
 0x9ec   : > { %1580 = vst.msk [vmem:[%s338_s29 + $0x8] sm:$0xff] %vm352_vm0, %v1578_v35 }
 0x9ed   : > { %1579 = vst.msk [vmem:[%s338_s29] sm:$0xff] %vm352_vm0, %v1577_v36 }
 0x9ee   : > { %2250 = shalt.err (!%p2247_p7)
}
 0x9ef   : > { %s2251_s16 = scalar_lea.hbm %s2741_s2, 256  ;;  %s2255_s18 = scalar_lea.hbm %s2793_s6, 512 }
 0x9f0   : > { %p2252_p9 = scmp.ne.s32.totalorder %s2741_s2, %s2251_s16  ;;  %p2256_p11 = scmp.lt.u32.totalorder %s2741_s2, %s2793_s6 }
 0x9f1   : > { %p2257_p2 = scmp.lt.u32.totalorder %s2255_s18, %s2251_s16  ;;  %p2259_p1 = scmp.lt.u32.totalorder %s2251_s16, %s2741_s2 }
 0x9f2   : > { %p2253_p0 = pnand %p2252_p9, %p2823_p13 }
 0x9f3   : > { %p2258_p12 = por %p2257_p2, %p2256_p11 }
 0x9f4   : > { %p2254_p8 = pneg %p2253_p0 }
 0x9f5   : > { %p2260_p6 = por %p2259_p1, %p2258_p12 }
 0x9f7   : > { %p2261_p10 = pnand %p2260_p6, %p2254_p8 }
 0x9f9   : > { %2264 = shalt.err (!%p2261_p10)
}
 0x9fa   : > { %s2335_s14 = smov 128   ;;  %s2336_s27 = smov 8  }
 0x9fb   : > { %1974 = dma.vmem_to_hbm [thread:$0]  (%p2823_p13), %s2736_s19, 256, %s2741_s2, %s1582_s10, %s2335_s14, %s2335_s14, %s2336_s27  }
 0x9fc PF: > { %s1610_s15 = sand.u32 1, %s2303_s21   ;;  %p2824_p4 = scmp.ne.s32.totalorder %s2805_s28, 0 }
 0x9fd   : > { %p2825_p5 = scmp.ge.s32.totalorder %s2315_s24, 2  ;;  %s1611_s7 = scalar_lea.sflag [#allocation4], %s1610_s15 }
 0x9ff   : > { %p1991_p3 = pnand %p2825_p5, %p2824_p4 }
 0xa01   : > { %2298 = dma.done.wait (!%p1991_p3), %s1611_s7, 256  }
 0xa02   : > { %2300 = vsyncadd (!%p1991_p3), %s1611_s7, 4294967040  ;;  %p23_p7 = scmp.ge.s32.totalorder %s2488_s8, 4   ;;  %s2826_s21 = smov %s2307_s22 }
 0xa03   : > { %s2827_s22 = smov %s2311_s23  ;;  %s2828_s23 = smov %s2504_s11 }
 0xa04   : > { %s2829_s24 = smov %s2488_s8  ;;  %25 = sbr.rel (!%p23_p7) target bundleno = 12 (0xc), region = 110 }
 0xa0b   :  { %1616 = vsyncpa [#allocation3], 1 }
 0xa0c   :  { %1618 = vsyncpa [#allocation3 + $0x1], 1 }
 0xa0d   :  { %1619 = vsyncpa [#allocation6], 1 }
 0xa0e   :  { %1621 = vsyncpa [#allocation6 + $0x1], 1 }
 0xa0f   :  { %1622 = vsyncpa [#allocation9], 1 }
 0xa10   :  { %1623 = vsyncpa [#allocation4], 1 }
 0xa11   :  { %1625 = vsyncpa [#allocation4 + $0x1], 1 }

</bundles_post_ra>
